<compile_context>
chip_gen: v6e
topology: v6e:2x2x1
jax: 0.10.0
libtpu: 0.0.40
codegen_flags: <defaults>
</compile_context>

<pallas_src>
import math
import functools

import jax
import jax.numpy as jnp
from jax import lax
from jax.experimental import pallas as pl
from jax.experimental.pallas import tpu as pltpu


def _round_up(x, m):
    return (x + m - 1) // m * m


@functools.lru_cache(maxsize=1)
def _vmem_capacity_bytes():
    try:
        return int(pltpu.get_tpu_info().vmem_capacity_bytes)
    except Exception:
        return 128 * 1024 * 1024  # conservative default (v5e/v6e size)


def _gelu(h, approx):
    if approx:
        # tanh-based GELU: the transcendental goes to the EUP slot (co-issues with MXU).
        c = math.sqrt(2.0 / math.pi)
        return 0.5 * h * (1.0 + jnp.tanh(c * (h + 0.044715 * (h * h * h))))
    # exact erf GELU -- matches nn.GELU()'s default
    return 0.5 * h * (1.0 + lax.erf(h * (1.0 / math.sqrt(2.0))))


def _mlp_kernel_fused(x_ref, w1_ref, b1_ref, w2_ref, b2_ref, o_ref, *, approx_gelu):
    # Whole hidden dim resident: (x @ W1 + b1) -> GELU -> (@ W2 + b2).
    x = x_ref[...].astype(w1_ref.dtype)  # per-tile cast on the VPU (hidden under MXU)
    h = jnp.dot(x, w1_ref[...], preferred_element_type=jnp.float32) + b1_ref[...]
    h = _gelu(h, approx_gelu)
    y = jnp.dot(h.astype(w2_ref.dtype), w2_ref[...], preferred_element_type=jnp.float32)
    o_ref[...] = (y + b2_ref[...]).astype(o_ref.dtype)  # dropout(p=0) == identity


def _mlp_kernel_split(x_ref, w1_ref, b1_ref, w2_ref, b2_ref, o_ref, acc_ref, *, approx_gelu):
    # Hidden dim split over grid axis 1 ("arbitrary"); accumulate fc2 in f32 scratch.
    k = pl.program_id(1)

    @pl.when(k == 0)
    def _():
        acc_ref[...] = jnp.zeros_like(acc_ref)

    x = x_ref[...].astype(w1_ref.dtype)
    h = jnp.dot(x, w1_ref[...], preferred_element_type=jnp.float32) + b1_ref[...]
    h = _gelu(h, approx_gelu)
    acc_ref[...] += jnp.dot(h.astype(w2_ref.dtype), w2_ref[...],
                            preferred_element_type=jnp.float32)

    @pl.when(k == pl.num_programs(1) - 1)
    def _():
        o_ref[...] = (acc_ref[...] + b2_ref[...]).astype(o_ref.dtype)


def _vmem_bytes(rt, in_p, ht, out_p, itm, out_itm, x_itm, nk, single_buffer_weights):
    """Rough VMEM footprint estimate (generous on GELU temporaries)."""
    wbuf = 1 if (nk == 1 and single_buffer_weights) else 2
    b = 2 * rt * in_p * x_itm                      # x tile (double-buffered, input dtype)
    b += 2 * rt * out_p * out_itm                  # out tile (double-buffered)
    b += wbuf * (in_p * ht + ht * out_p) * itm     # W1 / W2 (chunk) buffers
    b += wbuf * ht * 4 + 2 * out_p * 4             # b1 (chunk), b2 (f32)
    b += rt * in_p * itm                           # in-kernel cast of the x tile
    b += 3 * rt * ht * 4                           # fc1 activation + GELU temporaries (f32)
    if nk > 1:
        b += rt * out_p * 4                        # f32 accumulator scratch
    return b


@functools.partial(jax.jit, static_argnames=("row_tile", "hidden_tile", "approx_gelu",
                                              "matmul_dtype", "out_dtype",
                                              "single_buffer_weights"))
def _mlp_forward_impl(x, w1, b1, w2, b2, *, row_tile, hidden_tile, approx_gelu,
                      matmul_dtype, out_dtype, single_buffer_weights):
    B, N, in_f = x.shape
    hidden = w1.shape[1]
    out_f = w2.shape[1]
    out_dt = x.dtype if out_dtype is None else jnp.dtype(out_dtype)

    rows = B * N
    itm = jnp.dtype(matmul_dtype).itemsize
    out_itm = jnp.dtype(out_dt).itemsize
    x_itm = x.dtype.itemsize

    # --- lane-dense (multiple-of-128) feature dims ----------------------------
    in_p = _round_up(in_f, 128)
    hid_p = _round_up(hidden, 128)
    out_p = _round_up(out_f, 128)

    # --- row tiling: pad rows, guarantee >=2 programs when possible (v7x) -----
    rows8 = _round_up(rows, 8)
    rt = min(_round_up(row_tile, 8), rows8)
    if rows8 // rt < 2 and rows8 >= 16:
        rt = _round_up(-(-rows8 // 2), 8)  # split so both TensorCores get work
    rows_p = _round_up(rows, rt)

    # --- hidden tiling: resident weights if they fit VMEM, else chunk ---------
    vmem_cap = _vmem_capacity_bytes()
    budget = vmem_cap - (8 << 20)
    if hidden_tile is None:
        ht = hid_p
        while (ht > 128 and
               _vmem_bytes(rt, in_p, ht, out_p, itm, out_itm, x_itm,
                           -(-hid_p // ht), single_buffer_weights) > budget):
            ht = _round_up(max(128, ht // 2), 128)
    else:
        ht = min(_round_up(hidden_tile, 128), hid_p)
    hid_p = _round_up(hid_p, ht)
    nk = hid_p // ht

    # --- pad operands only when needed (skip the extra HBM pass otherwise) ----
    x2d = x.reshape(rows, in_f)
    if (rows_p, in_p) != (rows, in_f):
        x2d = jnp.pad(x2d, ((0, rows_p - rows), (0, in_p - in_f)))
    w1_p = w1.astype(matmul_dtype)
    if (in_p, hid_p) != (in_f, hidden):
        w1_p = jnp.pad(w1_p, ((0, in_p - in_f), (0, hid_p - hidden)))
    w2_p = w2.astype(matmul_dtype)
    if (hid_p, out_p) != (hidden, out_f):
        w2_p = jnp.pad(w2_p, ((0, hid_p - hidden), (0, out_p - out_f)))
    b1_p = b1.astype(jnp.float32)
    if hid_p != hidden:
        b1_p = jnp.pad(b1_p, (0, hid_p - hidden))
    b1_p = b1_p.reshape(1, hid_p)
    b2_p = b2.astype(jnp.float32)
    if out_p != out_f:
        b2_p = jnp.pad(b2_p, (0, out_p - out_f))
    b2_p = b2_p.reshape(1, out_p)

    # --- VMEM budget (clamped to device capacity) & cost hint -----------------
    vmem_est = _vmem_bytes(rt, in_p, ht, out_p, itm, out_itm, x_itm, nk,
                           single_buffer_weights) + (8 << 20)
    vmem_limit = int(min(max(32 << 20, vmem_est), vmem_cap - (8 << 20)))

    flops = 2 * rows_p * in_p * hid_p + 2 * rows_p * hid_p * out_p
    bytes_accessed = (rows_p * in_p * x_itm + in_p * hid_p * itm
                      + hid_p * out_p * itm + rows_p * out_p * out_itm
                      + (hid_p + out_p) * 4)
    cost = pl.CostEstimate(flops=flops, transcendentals=rows_p * hid_p,
                           bytes_accessed=bytes_accessed)

    def _const_spec(shape, index_map):
        # Resident operand: constant index_map -> double-buffering buys nothing.
        if single_buffer_weights:
            return pl.BlockSpec(shape, index_map, pipeline_mode=pl.Buffered(1))
        return pl.BlockSpec(shape, index_map)

    out_shape = jax.ShapeDtypeStruct((rows_p, out_p), out_dt)

    if nk == 1:
        grid_spec = pltpu.PrefetchScalarGridSpec(
            num_scalar_prefetch=0,
            grid=(rows_p // rt,),
            in_specs=[
                pl.BlockSpec((rt, in_p), lambda i: (i, 0)),       # x rows tile
                _const_spec((in_p, hid_p), lambda i: (0, 0)),     # W1 (resident)
                _const_spec((1, hid_p), lambda i: (0, 0)),        # b1 (f32)
                _const_spec((hid_p, out_p), lambda i: (0, 0)),    # W2 (resident)
                _const_spec((1, out_p), lambda i: (0, 0)),        # b2 (f32)
            ],
            out_specs=pl.BlockSpec((rt, out_p), lambda i: (i, 0)),
        )
        kernel = functools.partial(_mlp_kernel_fused, approx_gelu=approx_gelu)
        semantics = ("parallel",)
    else:
        grid_spec = pltpu.PrefetchScalarGridSpec(
            num_scalar_prefetch=0,
            grid=(rows_p // rt, nk),
            in_specs=[
                pl.BlockSpec((rt, in_p), lambda i, k: (i, 0)),    # x tile (reused over k)
                pl.BlockSpec((in_p, ht), lambda i, k: (0, k)),    # W1 hidden chunk
                pl.BlockSpec((1, ht), lambda i, k: (0, k)),       # b1 hidden chunk
                pl.BlockSpec((ht, out_p), lambda i, k: (k, 0)),   # W2 hidden chunk
                _const_spec((1, out_p), lambda i, k: (0, 0)),     # b2
            ],
            out_specs=pl.BlockSpec((rt, out_p), lambda i, k: (i, 0)),
            scratch_shapes=[pltpu.VMEM((rt, out_p), jnp.float32)],
        )
        kernel = functools.partial(_mlp_kernel_split, approx_gelu=approx_gelu)
        semantics = ("parallel", "arbitrary")

    out2d = pl.pallas_call(
        kernel,
        out_shape=out_shape,
        grid_spec=grid_spec,
        compiler_params=pltpu.CompilerParams(
            dimension_semantics=semantics,
            vmem_limit_bytes=vmem_limit,
        ),
        cost_estimate=cost,
    )(x2d, w1_p, b1_p, w2_p, b2_p)

    # TODO(synk): optional fp8 W1/W2 with per-tensor scales on v7x to halve resident
    # weight VMEM further (needs a scaling/accuracy pass, not drop-in).
    return out2d[:rows, :out_f].reshape(B, N, out_f)


def mlp_forward(x, w1, b1, w2, b2, *, row_tile=512, hidden_tile=None,
                approx_gelu=True, matmul_dtype=jnp.bfloat16, out_dtype=None):
    """x: (n_samples, n_patches+1, in_features) -> (..., out_features).

    w1: (in, hidden), b1: (hidden,), w2: (hidden, out), b2: (out,)
    (weights stored as the transpose of PyTorch's nn.Linear layout).
    approx_gelu=True uses the tanh GELU (EUP path, faster on v6e/v7x);
    approx_gelu=False matches nn.GELU()'s exact erf.
    """
    kwargs = dict(row_tile=row_tile, hidden_tile=hidden_tile, approx_gelu=approx_gelu,
                  matmul_dtype=matmul_dtype, out_dtype=out_dtype)
    try:
        return _mlp_forward_impl(x, w1, b1, w2, b2, single_buffer_weights=True, **kwargs)
    except Exception:
        # pl.Buffered(1) on pallas_call BlockSpecs not supported by this jax build:
        # fall back to default double-buffered resident weights (still correct).
        return _mlp_forward_impl(x, w1, b1, w2, b2, single_buffer_weights=False, **kwargs)


def init_params(key, in_features, hidden_features, out_features, dtype=jnp.float32):
    """Deterministic init mimicking nn.Linear's uniform(-1/sqrt(fan_in), 1/sqrt(fan_in))."""
    k1, k2, k3, k4 = jax.random.split(key, 4)
    lim1 = 1.0 / math.sqrt(in_features)
    lim2 = 1.0 / math.sqrt(hidden_features)
    # stored transposed relative to PyTorch: (in, out)
    w1 = jax.random.uniform(k1, (in_features, hidden_features), dtype, -lim1, lim1)
    b1 = jax.random.uniform(k2, (hidden_features,), dtype, -lim1, lim1)
    w2 = jax.random.uniform(k3, (hidden_features, out_features), dtype, -lim2, lim2)
    b2 = jax.random.uniform(k4, (out_features,), dtype, -lim2, lim2)
    return w1, b1, w2, b2


def _reference(x, w1, b1, w2, b2):
    B, N, in_f = x.shape
    h = x.reshape(-1, in_f) @ w1 + b1
    h = 0.5 * h * (1.0 + lax.erf(h / math.sqrt(2.0)))
    return (h @ w2 + b2).reshape(B, N, w2.shape[1])


if __name__ == "__main__":
    key = jax.random.PRNGKey(0)
    kx, kp, kx2, kp2 = jax.random.split(key, 4)

    # Small shapes consistent with the ViT MLP forward: (n_samples, n_patches+1, in_features)
    B, N = 2, 8
    in_features, hidden_features, out_features = 16, 32, 16

    x = jax.random.normal(kx, (B, N, in_features), jnp.float32)
    w1, b1, w2, b2 = init_params(kp, in_features, hidden_features, out_features)

    # default fast path: tanh GELU, bf16 matmul operands, f32 accumulation
    out_fast = mlp_forward(x, w1, b1, w2, b2)
    jax.block_until_ready(out_fast)

    # exact path (erf GELU, fp32 MXU) for a tight numerical check vs reference
    out_exact = mlp_forward(x, w1, b1, w2, b2, approx_gelu=False,
                            matmul_dtype=jnp.float32)
    jax.block_until_ready(out_exact)

    y_ref = _reference(x, w1, b1, w2, b2)
    assert out_exact.shape == (B, N, out_features)
    assert jnp.allclose(out_exact, y_ref, atol=1e-5, rtol=1e-5), "fp32 mismatch vs reference"
    assert jnp.allclose(out_fast, y_ref, atol=3e-2, rtol=3e-2), "bf16/tanh mismatch vs reference"

    # rows not a multiple of the tile + hidden-dim split (accumulator) path
    B2, N2 = 3, 5
    hidden2 = 256
    x2 = jax.random.normal(kx2, (B2, N2, in_features), jnp.float32)
    w1b, b1b, w2b, b2b = init_params(kp2, in_features, hidden2, out_features)
    out2 = mlp_forward(x2, w1b, b1b, w2b, b2b, hidden_tile=128,
                       approx_gelu=False, matmul_dtype=jnp.float32)
    jax.block_until_ready(out2)
    y2_ref = _reference(x2, w1b, b1b, w2b, b2b)
    assert out2.shape == (B2, N2, out_features)
    assert jnp.allclose(out2, y2_ref, atol=1e-4, rtol=1e-4), "split-path mismatch vs reference"

    print("KERNEL_OK")
</pallas_src>

<mosaic_0001>
module attributes {stable_mosaic.version = 11 : i64} {
  func.func @_mlp_kernel_fused(%arg0: i32, %arg1: memref<8x128xf32, #tpu.memory_space<vmem>>, %arg2: memref<128x128xbf16, #tpu.memory_space<vmem>>, %arg3: memref<1x128xf32, #tpu.memory_space<vmem>>, %arg4: memref<128x128xbf16, #tpu.memory_space<vmem>>, %arg5: memref<1x128xf32, #tpu.memory_space<vmem>>, %arg6: memref<8x128xf32, #tpu.memory_space<vmem>>) attributes {dimension_semantics = [#tpu.dimension_semantics<parallel>], iteration_bounds = array<i64: 2>, scalar_prefetch = 0 : i64, scratch_operands = 0 : i64, tpu.core_type = #tpu.core_type<tc>, window_params = [{transform_indices = @transform_0, window_bounds = array<i64: 8, 128>}, {pipeline_mode = #tpu.pipeline_mode<synchronous>, transform_indices = @transform_1, window_bounds = array<i64: 128, 128>}, {pipeline_mode = #tpu.pipeline_mode<synchronous>, transform_indices = @transform_2, window_bounds = array<i64: 1, 128>}, {pipeline_mode = #tpu.pipeline_mode<synchronous>, transform_indices = @transform_3, window_bounds = array<i64: 128, 128>}, {pipeline_mode = #tpu.pipeline_mode<synchronous>, transform_indices = @transform_4, window_bounds = array<i64: 1, 128>}, {transform_indices = @transform_5, window_bounds = array<i64: 8, 128>}]} {
    %c0 = arith.constant 0 : index
    %c0_0 = arith.constant 0 : index
    %0 = vector.load %arg1[%c0, %c0_0] : memref<8x128xf32, #tpu.memory_space<vmem>>, vector<8x128xf32>
    %1 = arith.truncf %0 : vector<8x128xf32> to vector<8x128xbf16>
    %c0_1 = arith.constant 0 : index
    %c0_2 = arith.constant 0 : index
    %2 = vector.load %arg2[%c0_1, %c0_2] : memref<128x128xbf16, #tpu.memory_space<vmem>>, vector<128x128xbf16>
    %cst = arith.constant dense<0.000000e+00> : vector<8x128xf32>
    %3 = tpu.matmul %1, %2, %cst {dimension_numbers = #tpu.dot_dimension_numbers<[1], [0], [0], [1], [0, 0, 1, 1], [], []>} : vector<8x128xbf16>, vector<128x128xbf16>, vector<8x128xf32> -> vector<8x128xf32>
    %c0_3 = arith.constant 0 : index
    %c0_4 = arith.constant 0 : index
    %4 = vector.load %arg3[%c0_3, %c0_4] : memref<1x128xf32, #tpu.memory_space<vmem>>, vector<1x128xf32>
    %5 = vector.broadcast %4 : vector<1x128xf32> to vector<8x128xf32>
    %6 = arith.addf %3, %5 : vector<8x128xf32>
    %cst_5 = arith.constant 5.000000e-01 : f32
    %7 = vector.broadcast %cst_5 : f32 to vector<8x128xf32>
    %8 = arith.mulf %7, %6 : vector<8x128xf32>
    %9 = arith.mulf %6, %6 : vector<8x128xf32>
    %10 = arith.mulf %9, %6 : vector<8x128xf32>
    %cst_6 = arith.constant 4.471500e-02 : f32
    %11 = vector.broadcast %cst_6 : f32 to vector<8x128xf32>
    %12 = arith.mulf %11, %10 : vector<8x128xf32>
    %13 = arith.addf %6, %12 : vector<8x128xf32>
    %cst_7 = arith.constant 0.797884583 : f32
    %14 = vector.broadcast %cst_7 : f32 to vector<8x128xf32>
    %15 = arith.mulf %14, %13 : vector<8x128xf32>
    %16 = math.tanh %15 : vector<8x128xf32>
    %cst_8 = arith.constant 1.000000e+00 : f32
    %17 = vector.broadcast %cst_8 : f32 to vector<8x128xf32>
    %18 = arith.addf %17, %16 : vector<8x128xf32>
    %19 = arith.mulf %8, %18 : vector<8x128xf32>
    %20 = arith.truncf %19 : vector<8x128xf32> to vector<8x128xbf16>
    %c0_9 = arith.constant 0 : index
    %c0_10 = arith.constant 0 : index
    %21 = vector.load %arg4[%c0_9, %c0_10] : memref<128x128xbf16, #tpu.memory_space<vmem>>, vector<128x128xbf16>
    %cst_11 = arith.constant dense<0.000000e+00> : vector<8x128xf32>
    %22 = tpu.matmul %20, %21, %cst_11 {dimension_numbers = #tpu.dot_dimension_numbers<[1], [0], [0], [1], [0, 0, 1, 1], [], []>} : vector<8x128xbf16>, vector<128x128xbf16>, vector<8x128xf32> -> vector<8x128xf32>
    %c0_12 = arith.constant 0 : index
    %c0_13 = arith.constant 0 : index
    %23 = vector.load %arg5[%c0_12, %c0_13] : memref<1x128xf32, #tpu.memory_space<vmem>>, vector<1x128xf32>
    %24 = vector.broadcast %23 : vector<1x128xf32> to vector<8x128xf32>
    %25 = arith.addf %22, %24 : vector<8x128xf32>
    %c0_14 = arith.constant 0 : index
    %c0_15 = arith.constant 0 : index
    %26 = vector.load %arg6[%c0_14, %c0_15] : memref<8x128xf32, #tpu.memory_space<vmem>>, vector<8x128xf32>
    tpu.vector_store %arg6[%c0_14, %c0_15], %25 {strides = array<i32>} : memref<8x128xf32, #tpu.memory_space<vmem>>, vector<8x128xf32>,
    return
  }
  func.func @transform_0(%arg0: i32) -> (i32, i32) {
    %c0_i32 = arith.constant 0 : i32
    %c0_i32_0 = arith.constant 0 : i32
    return %arg0, %c0_i32 : i32, i32
  }
  func.func @transform_1(%arg0: i32) -> (i32, i32) {
    %c0_i32 = arith.constant 0 : i32
    %c0_i32_0 = arith.constant 0 : i32
    %c0_i32_1 = arith.constant 0 : i32
    return %c0_i32, %c0_i32_0 : i32, i32
  }
  func.func @transform_2(%arg0: i32) -> (i32, i32) {
    %c0_i32 = arith.constant 0 : i32
    %c0_i32_0 = arith.constant 0 : i32
    %c0_i32_1 = arith.constant 0 : i32
    return %c0_i32, %c0_i32_0 : i32, i32
  }
  func.func @transform_3(%arg0: i32) -> (i32, i32) {
    %c0_i32 = arith.constant 0 : i32
    %c0_i32_0 = arith.constant 0 : i32
    %c0_i32_1 = arith.constant 0 : i32
    return %c0_i32, %c0_i32_0 : i32, i32
  }
  func.func @transform_4(%arg0: i32) -> (i32, i32) {
    %c0_i32 = arith.constant 0 : i32
    %c0_i32_0 = arith.constant 0 : i32
    %c0_i32_1 = arith.constant 0 : i32
    return %c0_i32, %c0_i32_0 : i32, i32
  }
  func.func @transform_5(%arg0: i32) -> (i32, i32) {
    %c0_i32 = arith.constant 0 : i32
    %c0_i32_0 = arith.constant 0 : i32
    return %arg0, %c0_i32 : i32, i32
  }
}

module attributes {stable_mosaic.version = 11 : i64} {
  func.func @_mlp_kernel_fused(%arg0: i32, %arg1: memref<8x128xf32, #tpu.memory_space<vmem>>, %arg2: memref<128x128xbf16, #tpu.memory_space<vmem>>, %arg3: memref<1x128xf32, #tpu.memory_space<vmem>>, %arg4: memref<128x128xbf16, #tpu.memory_space<vmem>>, %arg5: memref<1x128xf32, #tpu.memory_space<vmem>>, %arg6: memref<8x128xf32, #tpu.memory_space<vmem>>) attributes {dimension_semantics = [#tpu.dimension_semantics<parallel>], iteration_bounds = array<i64: 2>, scalar_prefetch = 0 : i64, scratch_operands = 0 : i64, tpu.core_type = #tpu.core_type<tc>, window_params = [{transform_indices = @transform_0, window_bounds = array<i64: 8, 128>}, {pipeline_mode = #tpu.pipeline_mode<synchronous>, transform_indices = @transform_1, window_bounds = array<i64: 128, 128>}, {pipeline_mode = #tpu.pipeline_mode<synchronous>, transform_indices = @transform_2, window_bounds = array<i64: 1, 128>}, {pipeline_mode = #tpu.pipeline_mode<synchronous>, transform_indices = @transform_3, window_bounds = array<i64: 128, 128>}, {pipeline_mode = #tpu.pipeline_mode<synchronous>, transform_indices = @transform_4, window_bounds = array<i64: 1, 128>}, {transform_indices = @transform_5, window_bounds = array<i64: 8, 128>}]} {
    %c0 = arith.constant 0 : index
    %c0_0 = arith.constant 0 : index
    %0 = vector.load %arg1[%c0, %c0_0] : memref<8x128xf32, #tpu.memory_space<vmem>>, vector<8x128xf32>
    %1 = arith.truncf %0 : vector<8x128xf32> to vector<8x128xbf16>
    %c0_1 = arith.constant 0 : index
    %c0_2 = arith.constant 0 : index
    %2 = vector.load %arg2[%c0_1, %c0_2] : memref<128x128xbf16, #tpu.memory_space<vmem>>, vector<128x128xbf16>
    %cst = arith.constant dense<0.000000e+00> : vector<8x128xf32>
    %3 = tpu.matmul %1, %2, %cst {dimension_numbers = #tpu.dot_dimension_numbers<[1], [0], [0], [1], [0, 0, 1, 1], [], []>} : vector<8x128xbf16>, vector<128x128xbf16>, vector<8x128xf32> -> vector<8x128xf32>
    %c0_3 = arith.constant 0 : index
    %c0_4 = arith.constant 0 : index
    %4 = vector.load %arg3[%c0_3, %c0_4] : memref<1x128xf32, #tpu.memory_space<vmem>>, vector<1x128xf32>
    %5 = vector.broadcast %4 : vector<1x128xf32> to vector<8x128xf32>
    %6 = arith.addf %3, %5 : vector<8x128xf32>
    %cst_5 = arith.constant 5.000000e-01 : f32
    %7 = vector.broadcast %cst_5 : f32 to vector<8x128xf32>
    %8 = arith.mulf %7, %6 : vector<8x128xf32>
    %9 = arith.mulf %6, %6 : vector<8x128xf32>
    %10 = arith.mulf %9, %6 : vector<8x128xf32>
    %cst_6 = arith.constant 4.471500e-02 : f32
    %11 = vector.broadcast %cst_6 : f32 to vector<8x128xf32>
    %12 = arith.mulf %11, %10 : vector<8x128xf32>
    %13 = arith.addf %6, %12 : vector<8x128xf32>
    %cst_7 = arith.constant 0.797884583 : f32
    %14 = vector.broadcast %cst_7 : f32 to vector<8x128xf32>
    %15 = arith.mulf %14, %13 : vector<8x128xf32>
    %16 = math.tanh %15 : vector<8x128xf32>
    %cst_8 = arith.constant 1.000000e+00 : f32
    %17 = vector.broadcast %cst_8 : f32 to vector<8x128xf32>
    %18 = arith.addf %17, %16 : vector<8x128xf32>
    %19 = arith.mulf %8, %18 : vector<8x128xf32>
    %20 = arith.truncf %19 : vector<8x128xf32> to vector<8x128xbf16>
    %c0_9 = arith.constant 0 : index
    %c0_10 = arith.constant 0 : index
    %21 = vector.load %arg4[%c0_9, %c0_10] : memref<128x128xbf16, #tpu.memory_space<vmem>>, vector<128x128xbf16>
    %cst_11 = arith.constant dense<0.000000e+00> : vector<8x128xf32>
    %22 = tpu.matmul %20, %21, %cst_11 {dimension_numbers = #tpu.dot_dimension_numbers<[1], [0], [0], [1], [0, 0, 1, 1], [], []>} : vector<8x128xbf16>, vector<128x128xbf16>, vector<8x128xf32> -> vector<8x128xf32>
    %c0_12 = arith.constant 0 : index
    %c0_13 = arith.constant 0 : index
    %23 = vector.load %arg5[%c0_12, %c0_13] : memref<1x128xf32, #tpu.memory_space<vmem>>, vector<1x128xf32>
    %24 = vector.broadcast %23 : vector<1x128xf32> to vector<8x128xf32>
    %25 = arith.addf %22, %24 : vector<8x128xf32>
    %c0_14 = arith.constant 0 : index
    %c0_15 = arith.constant 0 : index
    %26 = vector.load %arg6[%c0_14, %c0_15] : memref<8x128xf32, #tpu.memory_space<vmem>>, vector<8x128xf32>
    tpu.vector_store %arg6[%c0_14, %c0_15], %25 {strides = array<i32>} : memref<8x128xf32, #tpu.memory_space<vmem>>, vector<8x128xf32>,
    return
  }
  func.func @transform_0(%arg0: i32) -> (i32, i32) {
    %c0_i32 = arith.constant 0 : i32
    %c0_i32_0 = arith.constant 0 : i32
    return %arg0, %c0_i32 : i32, i32
  }
  func.func @transform_1(%arg0: i32) -> (i32, i32) {
    %c0_i32 = arith.constant 0 : i32
    %c0_i32_0 = arith.constant 0 : i32
    %c0_i32_1 = arith.constant 0 : i32
    return %c0_i32, %c0_i32_0 : i32, i32
  }
  func.func @transform_2(%arg0: i32) -> (i32, i32) {
    %c0_i32 = arith.constant 0 : i32
    %c0_i32_0 = arith.constant 0 : i32
    %c0_i32_1 = arith.constant 0 : i32
    return %c0_i32, %c0_i32_0 : i32, i32
  }
  func.func @transform_3(%arg0: i32) -> (i32, i32) {
    %c0_i32 = arith.constant 0 : i32
    %c0_i32_0 = arith.constant 0 : i32
    %c0_i32_1 = arith.constant 0 : i32
    return %c0_i32, %c0_i32_0 : i32, i32
  }
  func.func @transform_4(%arg0: i32) -> (i32, i32) {
    %c0_i32 = arith.constant 0 : i32
    %c0_i32_0 = arith.constant 0 : i32
    %c0_i32_1 = arith.constant 0 : i32
    return %c0_i32, %c0_i32_0 : i32, i32
  }
  func.func @transform_5(%arg0: i32) -> (i32, i32) {
    %c0_i32 = arith.constant 0 : i32
    %c0_i32_0 = arith.constant 0 : i32
    return %arg0, %c0_i32 : i32, i32
  }
}

</mosaic_0001>

<bundles_post_ra>
// kernel: _mlp_forward_impl.1
= control target key start
LH: loop header
LB: loop body
LE: loop exit
PB: predicated region body
PF: predicated region fallthrough
CT: control target
= control target key end

     0   :  { %s662_s18 = smov 0   ;;  %s740_s0 = inlined_call_operand.vmem [shape: f32[16,128], index: 0, kind: input, shape index: {}]   ;;  %s741_s1 = inlined_call_operand.vmem [shape: bf16[128,128], index: 1, kind: input, shape index: {}]   ;;  %s742_s2 = inlined_call_operand.vmem [shape: f32[1,128], index: 2, kind: input, shape index: {}]   ;;  %s743_s3 = inlined_call_operand.vmem [shape: bf16[128,128], index: 3, kind: input, shape index: {}]   ;;  %s744_s4 = inlined_call_operand.vmem [shape: f32[1,128], index: 4, kind: input, shape index: {}]   ;;  %s745_s5 = inlined_call_operand.vmem [shape: f32[16,128], index: 5, kind: output, shape index: {}]  }
   0x1 LB: > { %s509_s19 = sadd.s32 4294967295, %s628_s18   ;;  %p513_p0 = scmp.ge.s32.totalorder %s628_s18, 1  ;;  %s628_s18 = sphi %s662_s18, %s15_s18  }
   0x2   : > { %p186_p1 = scmp.lt.s32.totalorder %s628_s18, 3 }
   0x4   : > { %p187_p2 = pnand %p513_p0, %p186_p1 }
   0x5   : > { %p212_p3 = scmp.lt.s32.totalorder (!%p187_p2), %s509_s19, 1 }
   0x6   : > { %190 = sbr.rel (%p187_p2) target bundleno = 468 (0x1d4), region = 40 }
   0xb   : > { %v604_v0 = vld [vmem:[%s741_s1 + $0x38] sm:$0xff]   ;;  %v630_v1 = vmov 0.0   ;;  %v605_v2 = vld [vmem:[%s741_s1 + $0x30] sm:$0xff]   ;;  %vm631_vm0 = vmmov 0   ;;  %v606_v3 = vld [vmem:[%s741_s1 + $0x28] sm:$0xff]   ;;  %s747_s19 = smov (!%p212_p3, %s509_s19), 1 }
   0xc   : > { %554 = vmatprep.subr.bf16.mxu0 %v630_v1  ;;  %574 = vmatprep.subr.bf16.mxu1 %v630_v1  ;;  %v607_v4 = vld [vmem:[%s741_s1 + $0x20] sm:$0xff]   ;;  %v608_v5 = vld [vmem:[%s741_s1 + $0x18] sm:$0xff]   ;;  %v609_v6 = vld [vmem:[%s741_s1 + $0x10] sm:$0xff]   ;;  %s514_s7 = sshll.u32 %s747_s19, 3 }
   0xd   : > { %555 = vmatpush3.bf16.msra.mxu0 %v604_v0  ;;  %570 = vmatprep.mubr.msk.bf16.mxu0 %vm631_vm0, %v630_v1  ;;  %v610_v7 = vld [vmem:[%s741_s1 + $0x8] sm:$0xff]   ;;  %s215_s12 = scalar_lea.vmem %s740_s0, %s514_s7  ;;  %v611_v8 = vld [vmem:[%s741_s1] sm:$0xff]   ;;  %v612_v11 = vld [vmem:[%s743_s3 + $0x38] sm:$0xff]   ;;  %s219_s15 = scalar_lea.vmem %s745_s5, %s514_s7 }
   0xe   : > { %556 = vmatprep.subr.bf16.mxu0 %v630_v1  ;;  %590 = vmatprep.mubr.msk.bf16.mxu1 %vm631_vm0, %v630_v1  ;;  %v221_v9 = vld [vmem:[%s215_s12] sm:$0xff]  ;;  %v613_v12 = vld [vmem:[%s743_s3 + $0x30] sm:$0xff]   ;;  %v614_v13 = vld [vmem:[%s743_s3 + $0x28] sm:$0xff]  }
   0xf   : > { %v222_v10 = vpack.c.bf16 %v221_v9, %v221_v9  ;;  %575 = vmatpush3.bf16.msra.mxu1 %v612_v11  ;;  %v615_v14 = vld [vmem:[%s743_s3 + $0x20] sm:$0xff]   ;;  %v616_v15 = vld [vmem:[%s743_s3 + $0x18] sm:$0xff]   ;;  %v617_v16 = vld [vmem:[%s743_s3 + $0x10] sm:$0xff]  }
  0x10   : > { %576 = vmatprep.subr.bf16.mxu1 %v630_v1  ;;  %v618_v17 = vld [vmem:[%s743_s3 + $0x8] sm:$0xff]   ;;  %v619_v18 = vld [vmem:[%s743_s3] sm:$0xff]  }
  0x11   : > { %557 = vmatpush3.bf16.msra.mxu0 %v605_v2  ;;  %v516_v19 = vld [vmem:[%s742_s2] ss:$0 sm:$0xff] }
  0x12   : > { %558 = vmatprep.subr.bf16.mxu0 %v630_v1  ;;  %v525_v35 = vld [vmem:[%s744_s4] ss:$0 sm:$0xff] }
  0x13   : > { %577 = vmatpush3.bf16.msra.mxu1 %v613_v12 }
  0x14   : > { %578 = vmatprep.subr.bf16.mxu1 %v630_v1 }
  0x15   : > { %559 = vmatpush3.bf16.msra.mxu0 %v606_v3 }
  0x16   : > { %560 = vmatprep.subr.bf16.mxu0 %v630_v1 }
  0x17   : > { %579 = vmatpush3.bf16.msra.mxu1 %v614_v13 }
  0x18   : > { %580 = vmatprep.subr.bf16.mxu1 %v630_v1 }
  0x19   : > { %561 = vmatpush3.bf16.msra.mxu0 %v607_v4 }
  0x1a   : > { %562 = vmatprep.subr.bf16.mxu0 %v630_v1 }
  0x1b   : > { %581 = vmatpush3.bf16.msra.mxu1 %v615_v14 }
  0x1c   : > { %582 = vmatprep.subr.bf16.mxu1 %v630_v1 }
  0x1d   : > { %563 = vmatpush3.bf16.msra.mxu0 %v608_v5 }
  0x1e   : > { %564 = vmatprep.subr.bf16.mxu0 %v630_v1 }
  0x1f   : > { %583 = vmatpush3.bf16.msra.mxu1 %v616_v15 }
  0x20   : > { %584 = vmatprep.subr.bf16.mxu1 %v630_v1 }
  0x21   : > { %565 = vmatpush3.bf16.msra.mxu0 %v609_v6 }
  0x22   : > { %566 = vmatprep.subr.bf16.mxu0 %v630_v1 }
  0x23   : > { %585 = vmatpush3.bf16.msra.mxu1 %v617_v16 }
  0x24   : > { %586 = vmatprep.subr.bf16.mxu1 %v630_v1 }
  0x25   : > { %567 = vmatpush3.bf16.msra.mxu0 %v610_v7 }
  0x26   : > { %568 = vmatprep.subr.bf16.mxu0 %v630_v1 }
  0x27   : > { %587 = vmatpush3.bf16.msra.mxu1 %v618_v17 }
  0x28   : > { %588 = vmatprep.subr.bf16.mxu1 %v630_v1 }
  0x29   : > { %569 = vmatpush3.bf16.msra.mxu0 %v611_v8 }
  0x2b   : > { %589 = vmatpush3.bf16.msra.mxu1 %v619_v18 }
  0x2c   : > { %571 = vmatmul.mubr.bf16.vlgmr.msra.gmra.mxu0 %v222_v10 }
  0xec   : > { %v328_v20 = vpop.f32.mrf.mxu0 }
  0xed   : > { %v329_v21 = vadd.f32 %v516_v19, %v328_v20 }
  0xee   : > { %v572_v22 = vpop.f32.mrf.mxu0 }
  0xef   : > { %v335_v23 = vmul.f32 %v329_v21, %v329_v21  ;;  %v334_v31 = vmul.f32 0.5, %v329_v21 }
  0xf0   : > { %v331_v24 = vpop.f32.mrf.mxu0 }
  0xf1   : > { %v336_v25 = vmul.f32 %v335_v23, %v329_v21 }
  0xf2   : > { %v573_v26 = vpop.f32.mrf.mxu0 }
  0xf3   : > { %v337_v27 = vmul.f32 0.044715, %v336_v25 }
  0xf5   : > { %v338_v28 = vadd.f32 %v337_v27, %v329_v21 }
  0xf7   : > { %v339_v29 = vmul.f32 0.7978846, %v338_v28 }
  0xf9   : > { %620 = vtanh.f32 %v339_v29 }
 0x106   : > { %v621_v30 = vpop.eup %620 }
 0x107   : > { %v341_v32 = vadd.f32 1.0, %v621_v30 }
 0x109   : > { %v342_v33 = vmul.f32 %v341_v32, %v334_v31 }
 0x10b   : > { %v343_v34 = vpack.c.bf16 %v342_v33, %v342_v33 }
 0x10d   : > { %591 = vmatmul.mubr.bf16.vlgmr.msra.gmra.mxu1 %v343_v34 }
 0x1cd   : > { %v449_v36 = vpop.f32.mrf.mxu1 }
 0x1ce   : > { %v450_v37 = vadd.f32 %v525_v35, %v449_v36 }
 0x1cf   : > { %v592_v38 = vpop.f32.mrf.mxu1 }
 0x1d0   : > { %455 = vst [vmem:[%s219_s15] sm:$0xff] %v450_v37 }
 0x1d1   : > { %v452_v39 = vpop.f32.mrf.mxu1 }
 0x1d3   : > { %v593_v40 = vpop.f32.mrf.mxu1 }
 0x1d4 PF: > { %s15_s18 = sadd.s32 1, %s628_s18  }
 0x1d5   : > { %p12_p4 = scmp.ge.s32.totalorder %s15_s18, 4  }
 0x1d7   :  { %14 = sbr.rel (!%p12_p4) target bundleno = 1 (0x1), region = 70 }

// kernel: _mlp_forward_impl.1
= control target key start
LH: loop header
LB: loop body
LE: loop exit
PB: predicated region body
PF: predicated region fallthrough
CT: control target
= control target key end

     0   :  { %s662_s18 = smov 0   ;;  %s740_s0 = inlined_call_operand.vmem [shape: f32[16,128], index: 0, kind: input, shape index: {}]   ;;  %s741_s1 = inlined_call_operand.vmem [shape: bf16[128,128], index: 1, kind: input, shape index: {}]   ;;  %s742_s2 = inlined_call_operand.vmem [shape: f32[1,128], index: 2, kind: input, shape index: {}]   ;;  %s743_s3 = inlined_call_operand.vmem [shape: bf16[128,128], index: 3, kind: input, shape index: {}]   ;;  %s744_s4 = inlined_call_operand.vmem [shape: f32[1,128], index: 4, kind: input, shape index: {}]   ;;  %s745_s5 = inlined_call_operand.vmem [shape: f32[16,128], index: 5, kind: output, shape index: {}]  }
   0x1 LB: > { %s509_s19 = sadd.s32 4294967295, %s628_s18   ;;  %p513_p0 = scmp.ge.s32.totalorder %s628_s18, 1  ;;  %s628_s18 = sphi %s662_s18, %s15_s18  }
   0x2   : > { %p186_p1 = scmp.lt.s32.totalorder %s628_s18, 3 }
   0x4   : > { %p187_p2 = pnand %p513_p0, %p186_p1 }
   0x5   : > { %p212_p3 = scmp.lt.s32.totalorder (!%p187_p2), %s509_s19, 1 }
   0x6   : > { %190 = sbr.rel (%p187_p2) target bundleno = 468 (0x1d4), region = 40 }
   0xb   : > { %v604_v0 = vld [vmem:[%s741_s1 + $0x38] sm:$0xff]   ;;  %v630_v1 = vmov 0.0   ;;  %v605_v2 = vld [vmem:[%s741_s1 + $0x30] sm:$0xff]   ;;  %vm631_vm0 = vmmov 0   ;;  %v606_v3 = vld [vmem:[%s741_s1 + $0x28] sm:$0xff]   ;;  %s747_s19 = smov (!%p212_p3, %s509_s19), 1 }
   0xc   : > { %554 = vmatprep.subr.bf16.mxu0 %v630_v1  ;;  %574 = vmatprep.subr.bf16.mxu1 %v630_v1  ;;  %v607_v4 = vld [vmem:[%s741_s1 + $0x20] sm:$0xff]   ;;  %v608_v5 = vld [vmem:[%s741_s1 + $0x18] sm:$0xff]   ;;  %v609_v6 = vld [vmem:[%s741_s1 + $0x10] sm:$0xff]   ;;  %s514_s7 = sshll.u32 %s747_s19, 3 }
   0xd   : > { %555 = vmatpush3.bf16.msra.mxu0 %v604_v0  ;;  %570 = vmatprep.mubr.msk.bf16.mxu0 %vm631_vm0, %v630_v1  ;;  %v610_v7 = vld [vmem:[%s741_s1 + $0x8] sm:$0xff]   ;;  %s215_s12 = scalar_lea.vmem %s740_s0, %s514_s7  ;;  %v611_v8 = vld [vmem:[%s741_s1] sm:$0xff]   ;;  %v612_v11 = vld [vmem:[%s743_s3 + $0x38] sm:$0xff]   ;;  %s219_s15 = scalar_lea.vmem %s745_s5, %s514_s7 }
   0xe   : > { %556 = vmatprep.subr.bf16.mxu0 %v630_v1  ;;  %590 = vmatprep.mubr.msk.bf16.mxu1 %vm631_vm0, %v630_v1  ;;  %v221_v9 = vld [vmem:[%s215_s12] sm:$0xff]  ;;  %v613_v12 = vld [vmem:[%s743_s3 + $0x30] sm:$0xff]   ;;  %v614_v13 = vld [vmem:[%s743_s3 + $0x28] sm:$0xff]  }
   0xf   : > { %v222_v10 = vpack.c.bf16 %v221_v9, %v221_v9  ;;  %575 = vmatpush3.bf16.msra.mxu1 %v612_v11  ;;  %v615_v14 = vld [vmem:[%s743_s3 + $0x20] sm:$0xff]   ;;  %v616_v15 = vld [vmem:[%s743_s3 + $0x18] sm:$0xff]   ;;  %v617_v16 = vld [vmem:[%s743_s3 + $0x10] sm:$0xff]  }
  0x10   : > { %576 = vmatprep.subr.bf16.mxu1 %v630_v1  ;;  %v618_v17 = vld [vmem:[%s743_s3 + $0x8] sm:$0xff]   ;;  %v619_v18 = vld [vmem:[%s743_s3] sm:$0xff]  }
  0x11   : > { %557 = vmatpush3.bf16.msra.mxu0 %v605_v2  ;;  %v516_v19 = vld [vmem:[%s742_s2] ss:$0 sm:$0xff] }
  0x12   : > { %558 = vmatprep.subr.bf16.mxu0 %v630_v1  ;;  %v525_v35 = vld [vmem:[%s744_s4] ss:$0 sm:$0xff] }
  0x13   : > { %577 = vmatpush3.bf16.msra.mxu1 %v613_v12 }
  0x14   : > { %578 = vmatprep.subr.bf16.mxu1 %v630_v1 }
  0x15   : > { %559 = vmatpush3.bf16.msra.mxu0 %v606_v3 }
  0x16   : > { %560 = vmatprep.subr.bf16.mxu0 %v630_v1 }
  0x17   : > { %579 = vmatpush3.bf16.msra.mxu1 %v614_v13 }
  0x18   : > { %580 = vmatprep.subr.bf16.mxu1 %v630_v1 }
  0x19   : > { %561 = vmatpush3.bf16.msra.mxu0 %v607_v4 }
  0x1a   : > { %562 = vmatprep.subr.bf16.mxu0 %v630_v1 }
  0x1b   : > { %581 = vmatpush3.bf16.msra.mxu1 %v615_v14 }
  0x1c   : > { %582 = vmatprep.subr.bf16.mxu1 %v630_v1 }
  0x1d   : > { %563 = vmatpush3.bf16.msra.mxu0 %v608_v5 }
  0x1e   : > { %564 = vmatprep.subr.bf16.mxu0 %v630_v1 }
  0x1f   : > { %583 = vmatpush3.bf16.msra.mxu1 %v616_v15 }
  0x20   : > { %584 = vmatprep.subr.bf16.mxu1 %v630_v1 }
  0x21   : > { %565 = vmatpush3.bf16.msra.mxu0 %v609_v6 }
  0x22   : > { %566 = vmatprep.subr.bf16.mxu0 %v630_v1 }
  0x23   : > { %585 = vmatpush3.bf16.msra.mxu1 %v617_v16 }
  0x24   : > { %586 = vmatprep.subr.bf16.mxu1 %v630_v1 }
  0x25   : > { %567 = vmatpush3.bf16.msra.mxu0 %v610_v7 }
  0x26   : > { %568 = vmatprep.subr.bf16.mxu0 %v630_v1 }
  0x27   : > { %587 = vmatpush3.bf16.msra.mxu1 %v618_v17 }
  0x28   : > { %588 = vmatprep.subr.bf16.mxu1 %v630_v1 }
  0x29   : > { %569 = vmatpush3.bf16.msra.mxu0 %v611_v8 }
  0x2b   : > { %589 = vmatpush3.bf16.msra.mxu1 %v619_v18 }
  0x2c   : > { %571 = vmatmul.mubr.bf16.vlgmr.msra.gmra.mxu0 %v222_v10 }
  0xec   : > { %v328_v20 = vpop.f32.mrf.mxu0 }
  0xed   : > { %v329_v21 = vadd.f32 %v516_v19, %v328_v20 }
  0xee   : > { %v572_v22 = vpop.f32.mrf.mxu0 }
  0xef   : > { %v335_v23 = vmul.f32 %v329_v21, %v329_v21  ;;  %v334_v31 = vmul.f32 0.5, %v329_v21 }
  0xf0   : > { %v331_v24 = vpop.f32.mrf.mxu0 }
  0xf1   : > { %v336_v25 = vmul.f32 %v335_v23, %v329_v21 }
  0xf2   : > { %v573_v26 = vpop.f32.mrf.mxu0 }
  0xf3   : > { %v337_v27 = vmul.f32 0.044715, %v336_v25 }
  0xf5   : > { %v338_v28 = vadd.f32 %v337_v27, %v329_v21 }
  0xf7   : > { %v339_v29 = vmul.f32 0.7978846, %v338_v28 }
  0xf9   : > { %620 = vtanh.f32 %v339_v29 }
 0x106   : > { %v621_v30 = vpop.eup %620 }
 0x107   : > { %v341_v32 = vadd.f32 1.0, %v621_v30 }
 0x109   : > { %v342_v33 = vmul.f32 %v341_v32, %v334_v31 }
 0x10b   : > { %v343_v34 = vpack.c.bf16 %v342_v33, %v342_v33 }
 0x10d   : > { %591 = vmatmul.mubr.bf16.vlgmr.msra.gmra.mxu1 %v343_v34 }
 0x1cd   : > { %v449_v36 = vpop.f32.mrf.mxu1 }
 0x1ce   : > { %v450_v37 = vadd.f32 %v525_v35, %v449_v36 }
 0x1cf   : > { %v592_v38 = vpop.f32.mrf.mxu1 }
 0x1d0   : > { %455 = vst [vmem:[%s219_s15] sm:$0xff] %v450_v37 }
 0x1d1   : > { %v452_v39 = vpop.f32.mrf.mxu1 }
 0x1d3   : > { %v593_v40 = vpop.f32.mrf.mxu1 }
 0x1d4 PF: > { %s15_s18 = sadd.s32 1, %s628_s18  }
 0x1d5   : > { %p12_p4 = scmp.ge.s32.totalorder %s15_s18, 4  }
 0x1d7   :  { %14 = sbr.rel (!%p12_p4) target bundleno = 1 (0x1), region = 70 }

</bundles_post_ra>
